<compile_context>
chip_gen: v7x
topology: tpu7x:2x2x1
jax: 0.10.0
libtpu: 0.0.40
codegen_flags: <defaults>
</compile_context>

<pallas_src>
import functools

import jax
import jax.numpy as jnp
from jax.experimental import pallas as pl
from jax.experimental.pallas import tpu as pltpu


def _round_up(x, m):
    return (x + m - 1) // m * m


def _hps_kernel(feats_ref, w1f_ref, b1f_ref, w2f_ref, b2f_ref,
                rot_ref, betas_ref, *, hidden_dim, comp_width):
    D = hidden_dim
    W = comp_width
    x = feats_ref[...]                                           # (TB, D)

    # --- fused first layers: [pose fc1 | shape fc1] -> one MXU push ---
    z = jnp.dot(x, w1f_ref[...], preferred_element_type=jnp.float32) + b1f_ref[...]
    # LeakyReLU(0.01) on the pose half (lanes < D), ReLU on the shape half.
    lane = jax.lax.broadcasted_iota(jnp.int32, z.shape, 1)
    slope = jnp.where(lane < D, jnp.float32(0.01), jnp.float32(0.0))
    z = jnp.where(z > 0, z, slope * z)

    # --- fused block-diagonal second layers: [pose fc2 (comp-major, padded) | shape fc2] ---
    p = jnp.dot(z, w2f_ref[...], preferred_element_type=jnp.float32) + b2f_ref[...]

    # component-major 6D rep, each component a full 128-lane stripe:
    # [a1x | a2x | a1y | a2y | a1z | a2z]
    a1x = p[:, 0 * W:1 * W]; a2x = p[:, 1 * W:2 * W]
    a1y = p[:, 2 * W:3 * W]; a2y = p[:, 3 * W:4 * W]
    a1z = p[:, 4 * W:5 * W]; a2z = p[:, 5 * W:6 * W]

    # --- special Gram-Schmidt (roma.special_gramschmidt on (..., 3, 2)) ---
    eps = jnp.float32(1e-12)
    inv_n1 = jax.lax.rsqrt(a1x * a1x + a1y * a1y + a1z * a1z + eps)
    b1x, b1y, b1z = a1x * inv_n1, a1y * inv_n1, a1z * inv_n1
    dot = b1x * a2x + b1y * a2y + b1z * a2z
    u2x, u2y, u2z = a2x - dot * b1x, a2y - dot * b1y, a2z - dot * b1z
    inv_n2 = jax.lax.rsqrt(u2x * u2x + u2y * u2y + u2z * u2z + eps)
    b2x, b2y, b2z = u2x * inv_n2, u2y * inv_n2, u2z * inv_n2
    b3x = b1y * b2z - b1z * b2y
    b3y = b1z * b2x - b1x * b2z
    b3z = b1x * b2y - b1y * b2x

    # Rotation-matrix columns are [b1, b2, b3]; stripe index = row*3 + col.
    # Direct per-stripe stores (lane-dense, unmasked) -- no concatenate.
    rot_ref[:, 0 * W:1 * W] = b1x
    rot_ref[:, 1 * W:2 * W] = b2x
    rot_ref[:, 2 * W:3 * W] = b3x
    rot_ref[:, 3 * W:4 * W] = b1y
    rot_ref[:, 4 * W:5 * W] = b2y
    rot_ref[:, 5 * W:6 * W] = b3y
    rot_ref[:, 6 * W:7 * W] = b1z
    rot_ref[:, 7 * W:8 * W] = b2z
    rot_ref[:, 8 * W:9 * W] = b3z

    # --- MiniMLP body-shape head output (lanes 6W..6W+NBp of the fused fc2) ---
    betas_ref[...] = p[:, 6 * W:]


def pack_params(params, num_joints, comp_width=128):
    """One-time weight re-layout: fuse the two heads, permute the pose fc2 to
    component-major order and zero-pad every component to a 128-lane stripe."""
    f32 = jnp.float32
    D = params["w1"].shape[0]
    J = num_joints
    W = comp_width
    nb = params["ws2"].shape[-1]
    nbp = _round_up(nb, W)

    # fused first-layer weight/bias: (D, 2D), (1, 2D)
    w1f = jnp.concatenate([params["w1"], params["ws1"]], axis=1).astype(f32)
    b1f = jnp.concatenate([params["b1"], params["bs1"]], axis=0).astype(f32)[None, :]

    # pose fc2: PyTorch flat column j*6 + (row*2 + col)  ->  component-major, padded.
    w2 = params["w2"].astype(f32).reshape(D, J, 6).transpose(0, 2, 1)   # (D, 6, J)
    b2 = params["b2"].astype(f32).reshape(J, 6).T                       # (6, J)
    w2_pose = jnp.zeros((D, 6, W), f32).at[:, :, :J].set(w2).reshape(D, 6 * W)
    b2_pose = jnp.zeros((6, W), f32).at[:, :J].set(b2)
    # padded lanes get a1=(1,0,0), a2=(0,1,0) -> finite (identity) rotations, no NaN/Inf.
    b2_pose = b2_pose.at[0, J:].set(1.0).at[3, J:].set(1.0).reshape(6 * W)

    # shape fc2, lane-padded
    ws2 = jnp.zeros((D, nbp), f32).at[:, :nb].set(params["ws2"].astype(f32))
    bs2 = jnp.zeros((nbp,), f32).at[:nb].set(params["bs2"].astype(f32))

    # fused block-diagonal second-layer weight/bias: (2D, 6W + NBp), (1, 6W + NBp)
    w2f = jnp.zeros((2 * D, 6 * W + nbp), f32)
    w2f = w2f.at[:D, :6 * W].set(w2_pose).at[D:, 6 * W:].set(ws2)
    b2f = jnp.concatenate([b2_pose, bs2])[None, :]

    return w1f, b1f, w2f, b2f


@functools.partial(jax.jit,
                   static_argnames=("num_joints", "num_betas", "comp_width", "tile_b"))
def hps_estimator_forward(feats, w1f, b1f, w2f, b2f, *,
                          num_joints, num_betas, comp_width=128, tile_b=256):
    """Returns (pred_rotmat (B, J, 3, 3), pred_betas (B, num_betas))."""
    B, D = feats.shape
    J = num_joints
    W = comp_width
    nbp = w2f.shape[1] - 6 * W

    TB = min(tile_b, _round_up(B, 8))        # batch tile (sublane-aligned)
    B_pad = _round_up(B, TB)
    if B_pad != B:
        feats = jnp.pad(feats, ((0, B_pad - B), (0, 0)))

    kernel = functools.partial(_hps_kernel, hidden_dim=D, comp_width=W)
    rot_flat, betas_pad = pl.pallas_call(
        kernel,
        grid=(B_pad // TB,),
        in_specs=[
            pl.BlockSpec((TB, D), lambda i: (i, 0)),               # feats tile
            pl.BlockSpec((D, 2 * D), lambda i: (0, 0)),            # fused fc1 W (resident)
            pl.BlockSpec((1, 2 * D), lambda i: (0, 0)),            # fused fc1 b
            pl.BlockSpec((2 * D, 6 * W + nbp), lambda i: (0, 0)),  # fused fc2 W (resident)
            pl.BlockSpec((1, 6 * W + nbp), lambda i: (0, 0)),      # fused fc2 b
        ],
        out_specs=[
            pl.BlockSpec((TB, 9 * W), lambda i: (i, 0)),           # rot (comp-major, padded)
            pl.BlockSpec((TB, nbp), lambda i: (i, 0)),             # betas (padded)
        ],
        out_shape=[
            jax.ShapeDtypeStruct((B_pad, 9 * W), jnp.float32),
            jax.ShapeDtypeStruct((B_pad, nbp), jnp.float32),
        ],
        compiler_params=pltpu.CompilerParams(
            dimension_semantics=("parallel",)),
    )(feats, w1f, b1f, w2f, b2f)

    rot = rot_flat.reshape(B_pad, 9, W)[:B, :, :J]                 # (B, 9, J)
    pred_rotmat = rot.transpose(0, 2, 1).reshape(B, J, 3, 3)
    pred_betas = betas_pad[:B, :num_betas]
    return pred_rotmat, pred_betas


def reference_forward(feats, params, num_joints):
    """Pure-JAX reference of the same forward pass (natural PyTorch layout)."""
    J = num_joints
    h = feats @ params["w1"] + params["b1"]
    h = jnp.where(h > 0, h, 0.01 * h)
    p = h @ params["w2"] + params["b2"]                            # (B, J*6)
    m = p.reshape(-1, J, 3, 2)
    a1, a2 = m[..., 0], m[..., 1]
    b1 = a1 / jnp.linalg.norm(a1, axis=-1, keepdims=True)
    d = jnp.sum(b1 * a2, axis=-1, keepdims=True)
    u2 = a2 - d * b1
    b2 = u2 / jnp.linalg.norm(u2, axis=-1, keepdims=True)
    b3 = jnp.cross(b1, b2)
    rotmat = jnp.stack([b1, b2, b3], axis=-1)                      # (B, J, 3, 3)
    hs = jnp.maximum(feats @ params["ws1"] + params["bs1"], 0.0)
    betas = hs @ params["ws2"] + params["bs2"]
    return rotmat, betas


if __name__ == "__main__":
    B = 2                       # batch
    D = 32                      # encoder_latentD (small test size)
    J = 8                       # num_body_joints (small test size)
    NB_SHAPE = 10               # num_shape_coeffs

    key = jax.random.PRNGKey(0)
    ks = jax.random.split(key, 9)
    params = {
        "w1":  0.1 * jax.random.normal(ks[0], (D, D), jnp.float32),
        "b1":  0.1 * jax.random.normal(ks[1], (D,), jnp.float32),
        "w2":  0.1 * jax.random.normal(ks[2], (D, J * 6), jnp.float32),
        "b2":  0.1 * jax.random.normal(ks[3], (J * 6,), jnp.float32),
        "ws1": 0.1 * jax.random.normal(ks[4], (D, D), jnp.float32),
        "bs1": 0.1 * jax.random.normal(ks[5], (D,), jnp.float32),
        "ws2": 0.1 * jax.random.normal(ks[6], (D, NB_SHAPE), jnp.float32),
        "bs2": 0.1 * jax.random.normal(ks[7], (NB_SHAPE,), jnp.float32),
    }
    # stand-in for RepresentationWrapper output (cached embeddings path)
    feats = jax.random.normal(ks[8], (B, D), jnp.float32)

    # one-time weight re-layout (fuse + permute + lane-pad), hoisted out of the call path
    w1f, b1f, w2f, b2f = pack_params(params, J)

    pred_rotmat, pred_betas = hps_estimator_forward(
        feats, w1f, b1f, w2f, b2f, num_joints=J, num_betas=NB_SHAPE)
    jax.block_until_ready((pred_rotmat, pred_betas))

    ref_rotmat, ref_betas = reference_forward(feats, params, J)
    assert pred_rotmat.shape == (B, J, 3, 3)
    assert pred_betas.shape == (B, NB_SHAPE)
    assert jnp.allclose(pred_rotmat, ref_rotmat, atol=1e-4, rtol=1e-4)
    assert jnp.allclose(pred_betas, ref_betas, atol=1e-4, rtol=1e-4)

    print("KERNEL_OK")
</pallas_src>

<mosaic_0001>
module attributes {stable_mosaic.version = 11 : i64} {
  func.func @_hps_kernel(%arg0: i32, %arg1: memref<8x32xf32, #tpu.memory_space<vmem>>, %arg2: memref<32x64xf32, #tpu.memory_space<vmem>>, %arg3: memref<1x64xf32, #tpu.memory_space<vmem>>, %arg4: memref<64x896xf32, #tpu.memory_space<vmem>>, %arg5: memref<1x896xf32, #tpu.memory_space<vmem>>, %arg6: memref<8x1152xf32, #tpu.memory_space<vmem>>, %arg7: memref<8x128xf32, #tpu.memory_space<vmem>>) attributes {dimension_semantics = [#tpu.dimension_semantics<parallel>], iteration_bounds = array<i64: 1>, scalar_prefetch = 0 : i64, scratch_operands = 0 : i64, tpu.core_type = #tpu.core_type<tc>, window_params = [{transform_indices = @transform_0, window_bounds = array<i64: 8, 32>}, {pipeline_mode = #tpu.pipeline_mode<synchronous>, transform_indices = @transform_1, window_bounds = array<i64: 32, 64>}, {pipeline_mode = #tpu.pipeline_mode<synchronous>, transform_indices = @transform_2, window_bounds = array<i64: 1, 64>}, {pipeline_mode = #tpu.pipeline_mode<synchronous>, transform_indices = @transform_3, window_bounds = array<i64: 64, 896>}, {pipeline_mode = #tpu.pipeline_mode<synchronous>, transform_indices = @transform_4, window_bounds = array<i64: 1, 896>}, {transform_indices = @transform_5, window_bounds = array<i64: 8, 1152>}, {transform_indices = @transform_6, window_bounds = array<i64: 8, 128>}]} {
    %c0 = arith.constant 0 : index
    %c0_0 = arith.constant 0 : index
    %0 = vector.load %arg1[%c0, %c0_0] : memref<8x32xf32, #tpu.memory_space<vmem>>, vector<8x32xf32>
    %c0_1 = arith.constant 0 : index
    %c0_2 = arith.constant 0 : index
    %1 = vector.load %arg2[%c0_1, %c0_2] : memref<32x64xf32, #tpu.memory_space<vmem>>, vector<32x64xf32>
    %cst = arith.constant dense<0.000000e+00> : vector<8x64xf32>
    %2 = tpu.matmul %0, %1, %cst {dimension_numbers = #tpu.dot_dimension_numbers<[1], [0], [0], [1], [0, 0, 1, 1], [], []>} : vector<8x32xf32>, vector<32x64xf32>, vector<8x64xf32> -> vector<8x64xf32>
    %c0_3 = arith.constant 0 : index
    %c0_4 = arith.constant 0 : index
    %3 = vector.load %arg3[%c0_3, %c0_4] : memref<1x64xf32, #tpu.memory_space<vmem>>, vector<1x64xf32>
    %4 = vector.broadcast %3 : vector<1x64xf32> to vector<8x64xf32>
    %5 = arith.addf %2, %4 : vector<8x64xf32>
    %6 = tpu.iota {dimensions = array<i32: 1>} : vector<8x64xi32>
    %c32_i32 = arith.constant 32 : i32
    %7 = vector.broadcast %c32_i32 : i32 to vector<8x64xi32>
    %8 = arith.cmpi slt, %6, %7 : vector<8x64xi32>
    %cst_5 = arith.constant 0.00999999977 : f32
    %cst_6 = arith.constant 0.000000e+00 : f32
    %9 = vector.broadcast %cst_5 : f32 to vector<8x64xf32>
    %10 = vector.broadcast %cst_6 : f32 to vector<8x64xf32>
    %11 = arith.select %8, %9, %10 : vector<8x64xi1>, vector<8x64xf32>
    %cst_7 = arith.constant 0.000000e+00 : f32
    %12 = vector.broadcast %cst_7 : f32 to vector<8x64xf32>
    %13 = arith.cmpf ogt, %5, %12 : vector<8x64xf32>
    %14 = arith.mulf %11, %5 : vector<8x64xf32>
    %15 = arith.select %13, %5, %14 : vector<8x64xi1>, vector<8x64xf32>
    %c0_8 = arith.constant 0 : index
    %c0_9 = arith.constant 0 : index
    %16 = vector.load %arg4[%c0_8, %c0_9] : memref<64x896xf32, #tpu.memory_space<vmem>>, vector<64x896xf32>
    %cst_10 = arith.constant dense<0.000000e+00> : vector<8x896xf32>
    %17 = tpu.matmul %15, %16, %cst_10 {dimension_numbers = #tpu.dot_dimension_numbers<[1], [0], [0], [1], [0, 0, 1, 1], [], []>} : vector<8x64xf32>, vector<64x896xf32>, vector<8x896xf32> -> vector<8x896xf32>
    %c0_11 = arith.constant 0 : index
    %c0_12 = arith.constant 0 : index
    %18 = vector.load %arg5[%c0_11, %c0_12] : memref<1x896xf32, #tpu.memory_space<vmem>>, vector<1x896xf32>
    %19 = vector.broadcast %18 : vector<1x896xf32> to vector<8x896xf32>
    %20 = arith.addf %17, %19 : vector<8x896xf32>
    %21 = vector.extract_strided_slice %20 {offsets = [0, 0], sizes = [8, 128], strides = [1, 1]} : vector<8x896xf32> to vector<8x128xf32>
    %22 = vector.extract_strided_slice %20 {offsets = [0, 128], sizes = [8, 128], strides = [1, 1]} : vector<8x896xf32> to vector<8x128xf32>
    %23 = vector.extract_strided_slice %20 {offsets = [0, 256], sizes = [8, 128], strides = [1, 1]} : vector<8x896xf32> to vector<8x128xf32>
    %24 = vector.extract_strided_slice %20 {offsets = [0, 384], sizes = [8, 128], strides = [1, 1]} : vector<8x896xf32> to vector<8x128xf32>
    %25 = vector.extract_strided_slice %20 {offsets = [0, 512], sizes = [8, 128], strides = [1, 1]} : vector<8x896xf32> to vector<8x128xf32>
    %26 = vector.extract_strided_slice %20 {offsets = [0, 640], sizes = [8, 128], strides = [1, 1]} : vector<8x896xf32> to vector<8x128xf32>
    %27 = arith.mulf %21, %21 : vector<8x128xf32>
    %28 = arith.mulf %23, %23 : vector<8x128xf32>
    %29 = arith.addf %27, %28 : vector<8x128xf32>
    %30 = arith.mulf %25, %25 : vector<8x128xf32>
    %31 = arith.addf %29, %30 : vector<8x128xf32>
    %cst_13 = arith.constant 9.99999996E-13 : f32
    %32 = vector.broadcast %cst_13 : f32 to vector<8x128xf32>
    %33 = arith.addf %31, %32 : vector<8x128xf32>
    %34 = math.rsqrt %33 : vector<8x128xf32>
    %35 = arith.mulf %21, %34 : vector<8x128xf32>
    %36 = arith.mulf %23, %34 : vector<8x128xf32>
    %37 = arith.mulf %25, %34 : vector<8x128xf32>
    %38 = arith.mulf %35, %22 : vector<8x128xf32>
    %39 = arith.mulf %36, %24 : vector<8x128xf32>
    %40 = arith.addf %38, %39 : vector<8x128xf32>
    %41 = arith.mulf %37, %26 : vector<8x128xf32>
    %42 = arith.addf %40, %41 : vector<8x128xf32>
    %43 = arith.mulf %42, %35 : vector<8x128xf32>
    %44 = arith.subf %22, %43 : vector<8x128xf32>
    %45 = arith.mulf %42, %36 : vector<8x128xf32>
    %46 = arith.subf %24, %45 : vector<8x128xf32>
    %47 = arith.mulf %42, %37 : vector<8x128xf32>
    %48 = arith.subf %26, %47 : vector<8x128xf32>
    %49 = arith.mulf %44, %44 : vector<8x128xf32>
    %50 = arith.mulf %46, %46 : vector<8x128xf32>
    %51 = arith.addf %49, %50 : vector<8x128xf32>
    %52 = arith.mulf %48, %48 : vector<8x128xf32>
    %53 = arith.addf %51, %52 : vector<8x128xf32>
    %cst_14 = arith.constant 9.99999996E-13 : f32
    %54 = vector.broadcast %cst_14 : f32 to vector<8x128xf32>
    %55 = arith.addf %53, %54 : vector<8x128xf32>
    %56 = math.rsqrt %55 : vector<8x128xf32>
    %57 = arith.mulf %44, %56 : vector<8x128xf32>
    %58 = arith.mulf %46, %56 : vector<8x128xf32>
    %59 = arith.mulf %48, %56 : vector<8x128xf32>
    %60 = arith.mulf %36, %59 : vector<8x128xf32>
    %61 = arith.mulf %37, %58 : vector<8x128xf32>
    %62 = arith.subf %60, %61 : vector<8x128xf32>
    %63 = arith.mulf %37, %57 : vector<8x128xf32>
    %64 = arith.mulf %35, %59 : vector<8x128xf32>
    %65 = arith.subf %63, %64 : vector<8x128xf32>
    %66 = arith.mulf %35, %58 : vector<8x128xf32>
    %67 = arith.mulf %36, %57 : vector<8x128xf32>
    %68 = arith.subf %66, %67 : vector<8x128xf32>
    %c0_15 = arith.constant 0 : index
    %c0_16 = arith.constant 0 : index
    %69 = vector.load %arg6[%c0_15, %c0_16] : memref<8x1152xf32, #tpu.memory_space<vmem>>, vector<8x128xf32>
    tpu.vector_store %arg6[%c0_15, %c0_16], %35 {strides = array<i32>} : memref<8x1152xf32, #tpu.memory_space<vmem>>, vector<8x128xf32>,
    %c0_17 = arith.constant 0 : index
    %c128 = arith.constant 128 : index
    %70 = vector.load %arg6[%c0_17, %c128] : memref<8x1152xf32, #tpu.memory_space<vmem>>, vector<8x128xf32>
    tpu.vector_store %arg6[%c0_17, %c128], %57 {strides = array<i32>} : memref<8x1152xf32, #tpu.memory_space<vmem>>, vector<8x128xf32>,
    %c0_18 = arith.constant 0 : index
    %c256 = arith.constant 256 : index
    %71 = vector.load %arg6[%c0_18, %c256] : memref<8x1152xf32, #tpu.memory_space<vmem>>, vector<8x128xf32>
    tpu.vector_store %arg6[%c0_18, %c256], %62 {strides = array<i32>} : memref<8x1152xf32, #tpu.memory_space<vmem>>, vector<8x128xf32>,
    %c0_19 = arith.constant 0 : index
    %c384 = arith.constant 384 : index
    %72 = vector.load %arg6[%c0_19, %c384] : memref<8x1152xf32, #tpu.memory_space<vmem>>, vector<8x128xf32>
    tpu.vector_store %arg6[%c0_19, %c384], %36 {strides = array<i32>} : memref<8x1152xf32, #tpu.memory_space<vmem>>, vector<8x128xf32>,
    %c0_20 = arith.constant 0 : index
    %c512 = arith.constant 512 : index
    %73 = vector.load %arg6[%c0_20, %c512] : memref<8x1152xf32, #tpu.memory_space<vmem>>, vector<8x128xf32>
    tpu.vector_store %arg6[%c0_20, %c512], %58 {strides = array<i32>} : memref<8x1152xf32, #tpu.memory_space<vmem>>, vector<8x128xf32>,
    %c0_21 = arith.constant 0 : index
    %c640 = arith.constant 640 : index
    %74 = vector.load %arg6[%c0_21, %c640] : memref<8x1152xf32, #tpu.memory_space<vmem>>, vector<8x128xf32>
    tpu.vector_store %arg6[%c0_21, %c640], %65 {strides = array<i32>} : memref<8x1152xf32, #tpu.memory_space<vmem>>, vector<8x128xf32>,
    %c0_22 = arith.constant 0 : index
    %c768 = arith.constant 768 : index
    %75 = vector.load %arg6[%c0_22, %c768] : memref<8x1152xf32, #tpu.memory_space<vmem>>, vector<8x128xf32>
    tpu.vector_store %arg6[%c0_22, %c768], %37 {strides = array<i32>} : memref<8x1152xf32, #tpu.memory_space<vmem>>, vector<8x128xf32>,
    %c0_23 = arith.constant 0 : index
    %c896 = arith.constant 896 : index
    %76 = vector.load %arg6[%c0_23, %c896] : memref<8x1152xf32, #tpu.memory_space<vmem>>, vector<8x128xf32>
    tpu.vector_store %arg6[%c0_23, %c896], %59 {strides = array<i32>} : memref<8x1152xf32, #tpu.memory_space<vmem>>, vector<8x128xf32>,
    %c0_24 = arith.constant 0 : index
    %c1024 = arith.constant 1024 : index
    %77 = vector.load %arg6[%c0_24, %c1024] : memref<8x1152xf32, #tpu.memory_space<vmem>>, vector<8x128xf32>
    tpu.vector_store %arg6[%c0_24, %c1024], %68 {strides = array<i32>} : memref<8x1152xf32, #tpu.memory_space<vmem>>, vector<8x128xf32>,
    %78 = vector.extract_strided_slice %20 {offsets = [0, 768], sizes = [8, 128], strides = [1, 1]} : vector<8x896xf32> to vector<8x128xf32>
    %c0_25 = arith.constant 0 : index
    %c0_26 = arith.constant 0 : index
    %79 = vector.load %arg7[%c0_25, %c0_26] : memref<8x128xf32, #tpu.memory_space<vmem>>, vector<8x128xf32>
    tpu.vector_store %arg7[%c0_25, %c0_26], %78 {strides = array<i32>} : memref<8x128xf32, #tpu.memory_space<vmem>>, vector<8x128xf32>,
    return
  }
  func.func @transform_0(%arg0: i32) -> (i32, i32) {
    %c0_i32 = arith.constant 0 : i32
    %c0_i32_0 = arith.constant 0 : i32
    return %arg0, %c0_i32 : i32, i32
  }
  func.func @transform_1(%arg0: i32) -> (i32, i32) {
    %c0_i32 = arith.constant 0 : i32
    %c0_i32_0 = arith.constant 0 : i32
    %c0_i32_1 = arith.constant 0 : i32
    return %c0_i32, %c0_i32_0 : i32, i32
  }
  func.func @transform_2(%arg0: i32) -> (i32, i32) {
    %c0_i32 = arith.constant 0 : i32
    %c0_i32_0 = arith.constant 0 : i32
    %c0_i32_1 = arith.constant 0 : i32
    return %c0_i32, %c0_i32_0 : i32, i32
  }
  func.func @transform_3(%arg0: i32) -> (i32, i32) {
    %c0_i32 = arith.constant 0 : i32
    %c0_i32_0 = arith.constant 0 : i32
    %c0_i32_1 = arith.constant 0 : i32
    return %c0_i32, %c0_i32_0 : i32, i32
  }
  func.func @transform_4(%arg0: i32) -> (i32, i32) {
    %c0_i32 = arith.constant 0 : i32
    %c0_i32_0 = arith.constant 0 : i32
    %c0_i32_1 = arith.constant 0 : i32
    return %c0_i32, %c0_i32_0 : i32, i32
  }
  func.func @transform_5(%arg0: i32) -> (i32, i32) {
    %c0_i32 = arith.constant 0 : i32
    %c0_i32_0 = arith.constant 0 : i32
    return %arg0, %c0_i32 : i32, i32
  }
  func.func @transform_6(%arg0: i32) -> (i32, i32) {
    %c0_i32 = arith.constant 0 : i32
    %c0_i32_0 = arith.constant 0 : i32
    return %arg0, %c0_i32 : i32, i32
  }
}

</mosaic_0001>

<bundles_post_ra>
// kernel: hps_estimator_forward.1
= control target key start
LH: loop header
LB: loop body
LE: loop exit
PB: predicated region body
PF: predicated region fallthrough
CT: control target
= control target key end

     0   :  { %12 = vsyncpa [#allocation3], 0  ;;  %s887_s0 = inlined_call_operand.vmem [shape: f32[8,32], index: 0, kind: input, shape index: {}]   ;;  %s888_s1 = inlined_call_operand.hbm [shape: f32[32,64], index: 1, kind: input, shape index: {}]   ;;  %s889_s2 = inlined_call_operand.vmem [shape: f32[1,64], index: 2, kind: input, shape index: {}]   ;;  %s890_s3 = inlined_call_operand.hbm [shape: f32[64,896], index: 3, kind: input, shape index: {}]   ;;  %s891_s4 = inlined_call_operand.vmem [shape: f32[1,896], index: 4, kind: input, shape index: {}]   ;;  %s892_s5 = inlined_call_operand.vmem [shape: f32[8,1152], index: 5, kind: output, shape index: {0}]   ;;  %s893_s6 = inlined_call_operand.vmem [shape: f32[8,128], index: 6, kind: output, shape index: {1}]  }
   0x1   :  { %13 = vsyncpa [#allocation5], 0  ;;  %s760_s21 = smov [#allocation2]   ;;  %s712_s25 = scalar_lea.hbm %s888_s1, 512 }
   0x2   :  { %s21_s22 = sshll.u32 %s760_s21, 4  ;;  %p713_p0 = scmp.ne.s32.totalorder %s888_s1, %s712_s25  ;;  %s22_s22 = int_to_ptr.vmem [resolvable:$true] %s21_s22 }
   0x3   :  { %p716_p1 = scmp.lt.u32.totalorder %s712_s25, %s888_s1 }
   0x5   :  { %p718_p2 = pnand %p716_p1, %p713_p0 }
   0x7   :  { %721 = shalt.err (!%p718_p2)
}
   0x8   :  { %s722_s30 = scalar_lea.vmem %s22_s22, 512  ;;  %p727_p4 = scmp.lt.s32.totalorder %s22_s22, %s22_s22 }
   0x9   :  { %p723_p3 = scmp.ne.s32.totalorder %s22_s22, %s722_s30  ;;  %p728_p5 = scmp.lt.s32.totalorder %s722_s30, %s722_s30 }
   0xb   :  { %p729_p6 = por %p728_p5, %p727_p4 }
   0xd   :  { %p730_p7 = pnand %p729_p6, %p723_p3 }
   0xf   :  { %733 = shalt.err (!%p730_p7)
}
  0x10   :  { %s761_s7 = smov 128   ;;  %s762_s8 = smov 8  }
  0x11   :  { %27 = dma.hbm_to_vmem [thread:$0]  %s888_s1, 512, %s22_s22, [#allocation3], %s761_s7, %s761_s7, %s762_s8  }
  0x12   :  { %s763_s11 = smov [#allocation4]   ;;  %s734_s15 = scalar_lea.hbm %s890_s3, 7168 }
  0x13   :  { %s35_s12 = sshll.u32 %s763_s11, 4  ;;  %p735_p8 = scmp.ne.s32.totalorder %s890_s3, %s734_s15  ;;  %s36_s12 = int_to_ptr.vmem [resolvable:$true] %s35_s12 }
  0x14   :  { %p738_p9 = scmp.lt.u32.totalorder %s734_s15, %s890_s3 }
  0x16   :  { %p740_p10 = pnand %p738_p9, %p735_p8 }
  0x18   :  { %743 = shalt.err (!%p740_p10)
}
  0x19   :  { %s744_s20 = scalar_lea.vmem %s36_s12, 7168  ;;  %p749_p12 = scmp.lt.s32.totalorder %s36_s12, %s36_s12 }
  0x1a   :  { %p745_p11 = scmp.ne.s32.totalorder %s36_s12, %s744_s20  ;;  %p750_p13 = scmp.lt.s32.totalorder %s744_s20, %s744_s20 }
  0x1c   :  { %p751_p0 = por %p750_p13, %p749_p12 }
  0x1e   :  { %p752_p1 = pnand %p751_p0, %p745_p11 }
  0x20   :  { %755 = shalt.err (!%p752_p1)
}
  0x21   :  { %s764_s1 = smov 896   ;;  %s765_s21 = smov 56  }
  0x22   :  { %41 = dma.hbm_to_vmem [thread:$0]  %s890_s3, 7168, %s36_s12, [#allocation5], %s764_s1, %s764_s1, %s765_s21  }
  0x23   :  { %756 = dma.done.wait [#allocation3], 512  }
  0x24   :  { %757 = vsyncadd [#allocation3], 4294966784 }
  0x25   :  { %758 = dma.done.wait [#allocation5], 7168  }
  0x26   :  { %759 = vsyncadd [#allocation5], 4294960128  ;;  %v766_v0 = vmov 0.0|0.0   ;;  %vm767_vm0 = vmmov 0   ;;  %v768_v1 = vmov 0.0   ;;  %v51_v2 = vld [vmem:[#allocation2] sm:$0xff]  ;;  %v136_v60 = vlaneseq }
  0x27   :  { %633 = vmatprep.subr.bf16.mxu0 %v766_v0  ;;  %611 = vmatprep.mubr.msk.f32.mxu0 %vm767_vm0, %v768_v1  ;;  %v52_v3 = vld [vmem:[#allocation2 + $0x8] sm:$0xff]  ;;  %v53_v4 = vld [vmem:[#allocation2 + $0x10] sm:$0xff]  ;;  %v54_v6 = vld [vmem:[#allocation2 + $0x18] sm:$0xff]  ;;  %vm62_vm1 = vcmask 261120   ;;  %vm236_vm4 = vcmask 523264  }
  0x28   :  { %304 = vmatprep.mubr.f32.mxu1 %v768_v1  ;;  %v634_v5 = vpack.c.bf16 %v52_v3, %v51_v2  ;;  %v144_v7 = vld [vmem:[#allocation4 + $0x8] sm:$0xff]  ;;  %v151_v8 = vld [vmem:[#allocation4 + $0x40] sm:$0xff]  ;;  %v146_v9 = vld [vmem:[#allocation4 + $0x18] sm:$0xff]  ;;  %v637_v11 = vpack.c.bf16 %v54_v6, %v53_v4  ;;  %v137_v61 = vand.u32 127, %v136_v60 }
  0x29   :  { %v153_v10 = vld [vmem:[#allocation4 + $0x50] sm:$0xff]  ;;  %v639_v12 = vpack.c.bf16 %v151_v8, %v144_v7  ;;  %v143_v13 = vld [vmem:[#allocation4] sm:$0xff]  ;;  %v150_v14 = vld [vmem:[#allocation4 + $0x38] sm:$0xff] }
  0x2a   :  { %635 = vmatpush3.bf16.msra.mxu0 %v634_v5  ;;  %v145_v15 = vld [vmem:[#allocation4 + $0x10] sm:$0xff]  ;;  %v655_v16 = vpack.c.bf16 %v153_v10, %v146_v9  ;;  %v641_v17 = vpack.c.bf16 %v150_v14, %v143_v13  ;;  %v152_v18 = vld [vmem:[#allocation4 + $0x48] sm:$0xff]  ;;  %v158_v19 = vld [vmem:[#allocation4 + $0x78] sm:$0xff]  ;;  %vm138_vm2 = vcmp.lt.s32.totalorder %v137_v61, 32 }
  0x2b   :  { %636 = vmatprep.subr.bf16.mxu0 %v766_v0  ;;  %v165_v20 = vld [vmem:[#allocation4 + $0xb0] sm:$0xff]  ;;  %640 = vmatprep.subr.bf16.mxu1 %v639_v12  ;;  %v160_v22 = vld [vmem:[#allocation4 + $0x88] sm:$0xff]  ;;  %v167_v23 = vld [vmem:[#allocation4 + $0xc0] sm:$0xff]  ;;  %v657_v27 = vpack.c.bf16 %v152_v18, %v145_v15  ;;  %v139_v4 = vsel %vm138_vm2, 0.01, %v768_v1 }
  0x2c   :  { %v643_v21 = vpack.c.bf16 %v165_v20, %v158_v19  ;;  %v157_v24 = vld [vmem:[#allocation4 + $0x70] sm:$0xff]  ;;  %v50_v25 = vld [vmem:[%s887_s0] sm:$0xff]  ;;  %642 = vmatpush1.bf16.msra.mxu1 %v641_v17  ;;  %v164_v26 = vld [vmem:[#allocation4 + $0xa8] sm:$0xff]  ;;  %v659_v32 = vpack.c.bf16 %v167_v23, %v160_v22 }
  0x2d   :  { %v645_v28 = vpack.c.bf16 %v164_v26, %v157_v24  ;;  %v159_v29 = vld [vmem:[#allocation4 + $0x80] sm:$0xff]  ;;  %v172_v30 = vld [vmem:[#allocation4 + $0xe8] sm:$0xff]  ;;  %v166_v33 = vld [vmem:[#allocation4 + $0xb8] sm:$0xff] }
  0x2e   :  { %638 = vmatpush3.bf16.msra.mxu0 %v637_v11  ;;  %644 = vmatprep.subr.bf16.mxu1 %v643_v21  ;;  %v179_v31 = vld [vmem:[#allocation4 + $0x120] sm:$0xff]  ;;  %v178_v36 = vld [vmem:[#allocation4 + $0x118] sm:$0xff]  ;;  %v181_v38 = vld [vmem:[#allocation4 + $0x130] sm:$0xff]  ;;  %v661_v40 = vpack.c.bf16 %v166_v33, %v159_v29 }
  0x2f   :  { %656 = vmatprep.subr.bf16.mxu0 %v655_v16  ;;  %v647_v34 = vpack.c.bf16 %v179_v31, %v172_v30  ;;  %v171_v35 = vld [vmem:[#allocation4 + $0xe0] sm:$0xff]  ;;  %v174_v37 = vld [vmem:[#allocation4 + $0xf8] sm:$0xff]  ;;  %v173_v42 = vld [vmem:[#allocation4 + $0xf0] sm:$0xff] }
  0x30   :  { %646 = vmatpush1.bf16.msra.mxu1 %v645_v28  ;;  %v649_v39 = vpack.c.bf16 %v178_v36, %v171_v35  ;;  %v663_v41 = vpack.c.bf16 %v181_v38, %v174_v37  ;;  %v180_v43 = vld [vmem:[#allocation4 + $0x128] sm:$0xff]  ;;  %v186_v45 = vld [vmem:[#allocation4 + $0x158] sm:$0xff]  ;;  %v193_v46 = vld [vmem:[#allocation4 + $0x190] sm:$0xff] }
  0x31   :  { %612 = vmatmul.mubr.msk.f32.vlgmr.msra.gmra.mrb[0].mxu0 %vm62_vm1, %v50_v25  ;;  %648 = vmatprep.subr.bf16.mxu1 %v647_v34  ;;  %v665_v44 = vpack.c.bf16 %v180_v43, %v173_v42  ;;  %v188_v47 = vld [vmem:[#allocation4 + $0x168] sm:$0xff]  ;;  %v651_v48 = vpack.c.bf16 %v193_v46, %v186_v45  ;;  %v195_v49 = vld [vmem:[#allocation4 + $0x1a0] sm:$0xff]  ;;  %v185_v50 = vld [vmem:[#allocation4 + $0x150] sm:$0xff] }
  0x32   :  { %658 = vmatpush1.bf16.msra.mxu0 %v657_v27  ;;  %375 = vmatprep.mubr.f32.mxu0 %v768_v1  ;;  %v192_v51 = vld [vmem:[#allocation4 + $0x188] sm:$0xff]  ;;  %v667_v52 = vpack.c.bf16 %v195_v49, %v188_v47  ;;  %v187_v54 = vld [vmem:[#allocation4 + $0x160] sm:$0xff]  ;;  %v194_v55 = vld [vmem:[#allocation4 + $0x198] sm:$0xff] }
  0x33   :  { %660 = vmatprep.subr.bf16.mxu0 %v659_v32  ;;  %v653_v53 = vpack.c.bf16 %v192_v51, %v185_v50  ;;  %v669_v56 = vpack.c.bf16 %v194_v55, %v187_v54  ;;  %v148_v57 = vld [vmem:[#allocation4 + $0x28] sm:$0xff]  ;;  %v155_v58 = vld [vmem:[#allocation4 + $0x60] sm:$0xff]  ;;  %v154_v2 = vld [vmem:[#allocation4 + $0x58] sm:$0xff] }
  0x34   :  { %650 = vmatpush1.bf16.msra.mxu1 %v649_v39  ;;  %v671_v59 = vpack.c.bf16 %v155_v58, %v148_v57  ;;  %v583_v62 = vld [vmem:[%s889_s2] ss:$0 sm:$0xff]  ;;  %v149_v5 = vld [vmem:[#allocation4 + $0x30] sm:$0xff]  ;;  %v156_v6 = vld [vmem:[#allocation4 + $0x68] sm:$0xff] }
  0x35   :  { %652 = vmatprep.subr.bf16.mxu1 %v651_v48  ;;  %v147_v63 = vld [vmem:[#allocation4 + $0x20] sm:$0xff]  ;;  %v162_v9 = vld [vmem:[#allocation4 + $0x98] sm:$0xff]  ;;  %v169_v10 = vld [vmem:[#allocation4 + $0xd0] sm:$0xff]  ;;  %v688_v13 = vpack.c.bf16 %v156_v6, %v149_v5 }
  0x36   :  { %662 = vmatpush1.bf16.msra.mxu0 %v661_v40  ;;  %v673_v11 = vpack.c.bf16 %v154_v2, %v147_v63  ;;  %v161_v14 = vld [vmem:[#allocation4 + $0x90] sm:$0xff]  ;;  %v675_v15 = vpack.c.bf16 %v169_v10, %v162_v9  ;;  %v168_v16 = vld [vmem:[#allocation4 + $0xc8] sm:$0xff]  ;;  %v163_v17 = vld [vmem:[#allocation4 + $0xa0] sm:$0xff] }
  0x37   :  { %664 = vmatprep.subr.bf16.mxu0 %v663_v41  ;;  %v170_v18 = vld [vmem:[#allocation4 + $0xd8] sm:$0xff]  ;;  %v176_v20 = vld [vmem:[#allocation4 + $0x108] sm:$0xff]  ;;  %v183_v21 = vld [vmem:[#allocation4 + $0x140] sm:$0xff]  ;;  %v677_v22 = vpack.c.bf16 %v168_v16, %v161_v14 }
  0x38   :  { %654 = vmatpush1.bf16.msra.mxu1 %v653_v53  ;;  %v691_v23 = vpack.c.bf16 %v170_v18, %v163_v17  ;;  %v175_v24 = vld [vmem:[#allocation4 + $0x100] sm:$0xff]  ;;  %v679_v25 = vpack.c.bf16 %v183_v21, %v176_v20  ;;  %v182_v26 = vld [vmem:[#allocation4 + $0x138] sm:$0xff]  ;;  %v177_v27 = vld [vmem:[#allocation4 + $0x110] sm:$0xff] }
  0x39   :  { %672 = vmatprep.subr.bf16.mxu1 %v671_v59  ;;  %v184_v28 = vld [vmem:[#allocation4 + $0x148] sm:$0xff]  ;;  %v190_v29 = vld [vmem:[#allocation4 + $0x178] sm:$0xff]  ;;  %v197_v30 = vld [vmem:[#allocation4 + $0x1b0] sm:$0xff]  ;;  %v681_v31 = vpack.c.bf16 %v182_v26, %v175_v24 }
  0x3a   :  { %666 = vmatpush1.bf16.msra.mxu0 %v665_v44  ;;  %v694_v32 = vpack.c.bf16 %v184_v28, %v177_v27  ;;  %v189_v33 = vld [vmem:[#allocation4 + $0x170] sm:$0xff]  ;;  %v683_v34 = vpack.c.bf16 %v197_v30, %v190_v29  ;;  %v196_v35 = vld [vmem:[#allocation4 + $0x1a8] sm:$0xff]  ;;  %v191_v36 = vld [vmem:[#allocation4 + $0x180] sm:$0xff] }
  0x3b   :  { %668 = vmatprep.subr.bf16.mxu0 %v667_v52  ;;  %v198_v37 = vld [vmem:[#allocation4 + $0x1b8] sm:$0xff]  ;;  %v685_v38 = vpack.c.bf16 %v196_v35, %v189_v33  ;;  %v199_v42 = vld [vmem:[%s891_s4] sm:$0xff] }
  0x3c   :  { %v697_v39 = vpack.c.bf16 %v198_v37, %v191_v36 }
  0x3e   :  { %670 = vmatpush1.bf16.msra.mxu0 %v669_v56 }
  0x3f   :  { %687 = vmatprep.subr.bf16.mxu0 %v766_v0 }
 0x104   :  { %v132_v3 = vpop.f32.mrb[0].mxu0 }
 0x105   :  { %v133_v7 = vadd.f32 %v583_v62, %v132_v3  ;;  %v613_v8 = vpop.f32.mrb[1].mxu0 }
 0x107   :  { %vm140_vm3 = vcmp.gt.f32.partialorder %v133_v7, 0.0  ;;  %v141_v12 = vmul.f32 %v139_v4, %v133_v7 }
 0x109   :  { %v142_v19 = vsel %vm140_vm3, %v133_v7, %v141_v12 }
 0x10a   :  { %585 = vmatmul.mubr.msk.f32.vlgmr.msra.gmra.mrb[0].mxu1 %vm236_vm4, %v142_v19  ;;  %586 = vmatmul.mubr.msk.f32.vlgmr.msra.gmra.mrb[2].mxu0 %vm236_vm4, %v142_v19 }
 0x10b   :  { %674 = vmatpush1.bf16.msra.mxu1 %v673_v11  ;;  %689 = vmatpush3.bf16.msra.mxu0 %v688_v13 }
 0x10c   :  { %676 = vmatprep.subr.bf16.mxu1 %v675_v15  ;;  %690 = vmatprep.subr.bf16.mxu0 %v766_v0 }
 0x10d   :  { %446 = vmatprep.mubr.f32.mxu1 %v768_v1  ;;  %630 = vmatprep.mubr.msk.f32.mxu0 %vm767_vm0, %v768_v1  ;;  %v202_v1 = vshrl.u32 %v136_v60, 7 }
 0x10f   :  { %678 = vmatpush1.bf16.msra.mxu1 %v677_v22  ;;  %692 = vmatpush3.bf16.msra.mxu0 %v691_v23  ;;  %v203_v40 = vsub.s32 0, %v202_v1  ;;  %v211_v41 = vsub.s32 2, %v202_v1  ;;  %v207_v43 = vsub.s32 1, %v202_v1  ;;  %v215_v44 = vsub.s32 3, %v202_v1 }
 0x110   :  { %680 = vmatprep.subr.bf16.mxu1 %v679_v25  ;;  %693 = vmatprep.subr.bf16.mxu0 %v766_v0  ;;  %v219_v59 = vsub.s32 4, %v202_v1  ;;  %v227_v60 = vsub.s32 6, %v202_v1  ;;  %v223_v61 = vsub.s32 5, %v202_v1 }
 0x111   :  { %v204_v45 = vrot.slane %v199_v42, %v203_v40  ;;  %v212_v46 = vrot.slane %v199_v42, %v211_v41  ;;  %v208_v47 = vrot.slane %v199_v42, %v207_v43 }
 0x112   :  { %v220_v62 = vrot.slane %v199_v42, %v219_v59  ;;  %v228_v63 = vrot.slane %v199_v42, %v227_v60  ;;  %v224_v2 = vrot.slane %v199_v42, %v223_v61 }
 0x113   :  { %682 = vmatpush1.bf16.msra.mxu1 %v681_v31  ;;  %695 = vmatpush3.bf16.msra.mxu0 %v694_v32 }
 0x114   :  { %684 = vmatprep.subr.bf16.mxu1 %v683_v34  ;;  %696 = vmatprep.subr.bf16.mxu0 %v766_v0  ;;  %v216_v0 = vrot.slane %v199_v42, %v215_v44 }
 0x117   :  { %686 = vmatpush1.bf16.msra.mxu1 %v685_v38  ;;  %698 = vmatpush3.bf16.msra.mxu0 %v697_v39 }
 0x11a   :  { %587 = vmatmul.mubr.msk.f32.vlgmr.msra.gmra.mrb[2].mxu1 %vm236_vm4, %v142_v19  ;;  %631 = vmatmul.mubr.msk.f32.vlgmr.msra.gmra.mrb[4].mxu0 %vm236_vm4, %v142_v19 }
 0x1dd   :  { %v306_v48 = vpop.f32.mrb[0].mxu1  ;;  %v377_v49 = vpop.f32.mrb[2].mxu0 }
 0x1de   :  { %v307_v50 = vadd.f32 %v306_v48, %v204_v45  ;;  %v378_v51 = vadd.f32 %v377_v49, %v212_v46  ;;  %v308_v52 = vpop.f32.mrb[1].mxu1  ;;  %v379_v53 = vpop.f32.mrb[3].mxu0 }
 0x1df   :  { %v309_v54 = vadd.f32 %v308_v52, %v208_v47  ;;  %v380_v55 = vadd.f32 %v379_v53, %v216_v0 }
 0x1e0   :  { %v523_v56 = vmul.f32 %v307_v50, %v307_v50  ;;  %v524_v57 = vmul.f32 %v378_v51, %v378_v51 }
 0x1e2   :  { %v525_v58 = vadd.f32 %v524_v57, %v523_v56 }
 0x1ed   :  { %v448_v3 = vpop.f32.mrb[2].mxu1  ;;  %v519_v4 = vpop.f32.mrb[4].mxu0 }
 0x1ee   :  { %v449_v5 = vadd.f32 %v448_v3, %v220_v62  ;;  %v520_v6 = vadd.f32 %v519_v4, %v228_v63  ;;  %v450_v7 = vpop.f32.mrb[3].mxu1  ;;  %v632_v8 = vpop.f32.mrb[5].mxu0 }
 0x1ef   :  { %v451_v9 = vadd.f32 %v450_v7, %v224_v2 }
 0x1f0   :  { %v526_v10 = vmul.f32 %v449_v5, %v449_v5  ;;  %572 = vst [vmem:[%s893_s6] sm:$0xff] %v520_v6 }
 0x1f2   :  { %v527_v11 = vadd.f32 %v526_v10, %v525_v58 }
 0x1f4   :  { %v528_v12 = vadd.f32 1e-12, %v527_v11 }
 0x1f6   :  { %708 = vrsqrt.f32 %v528_v12 }
 0x200   :  { %v709_v13 = vpop.eup %708 }
 0x201   :  { %v532_v14 = vmul.f32 %v709_v13, %v449_v5  ;;  %v530_v15 = vmul.f32 %v709_v13, %v307_v50  ;;  %v531_v16 = vmul.f32 %v709_v13, %v378_v51 }
 0x203   :  { %569 = vst [vmem:[%s892_s5 + $0x30] sm:$0xff] %v532_v14  ;;  %v533_v17 = vmul.f32 %v530_v15, %v309_v54  ;;  %v534_v18 = vmul.f32 %v531_v16, %v380_v55  ;;  %v536_v19 = vmul.f32 %v532_v14, %v451_v9  ;;  %563 = vst [vmem:[%s892_s5] sm:$0xff] %v530_v15 }
 0x204   :  { %566 = vst [vmem:[%s892_s5 + $0x18] sm:$0xff] %v531_v16 }
 0x205   :  { %v535_v20 = vadd.f32 %v534_v18, %v533_v17 }
 0x207   :  { %v537_v21 = vadd.f32 %v536_v19, %v535_v20 }
 0x209   :  { %v538_v22 = vmul.f32 %v537_v21, %v530_v15  ;;  %v540_v23 = vmul.f32 %v537_v21, %v531_v16  ;;  %v542_v24 = vmul.f32 %v537_v21, %v532_v14 }
 0x20b   :  { %v539_v25 = vsub.f32 %v309_v54, %v538_v22  ;;  %v541_v26 = vsub.f32 %v380_v55, %v540_v23  ;;  %v543_v27 = vsub.f32 %v451_v9, %v542_v24 }
 0x20d   :  { %v544_v28 = vmul.f32 %v539_v25, %v539_v25  ;;  %v545_v29 = vmul.f32 %v541_v26, %v541_v26  ;;  %v547_v31 = vmul.f32 %v543_v27, %v543_v27 }
 0x20f   :  { %v546_v30 = vadd.f32 %v545_v29, %v544_v28 }
 0x211   :  { %v548_v32 = vadd.f32 %v547_v31, %v546_v30 }
 0x213   :  { %v549_v33 = vadd.f32 1e-12, %v548_v32 }
 0x215   :  { %710 = vrsqrt.f32 %v549_v33 }
 0x21f   :  { %v711_v34 = vpop.eup %710 }
 0x220   :  { %v551_v35 = vmul.f32 %v711_v34, %v539_v25  ;;  %v552_v36 = vmul.f32 %v711_v34, %v541_v26  ;;  %v553_v37 = vmul.f32 %v711_v34, %v543_v27 }
 0x222   :  { %v554_v38 = vmul.f32 %v553_v37, %v531_v16  ;;  %v555_v39 = vmul.f32 %v552_v36, %v532_v14  ;;  %v557_v1 = vmul.f32 %v551_v35, %v532_v14  ;;  %v558_v40 = vmul.f32 %v553_v37, %v530_v15  ;;  %564 = vst [vmem:[%s892_s5 + $0x8] sm:$0xff] %v551_v35 }
 0x223   :  { %567 = vst [vmem:[%s892_s5 + $0x20] sm:$0xff] %v552_v36  ;;  %570 = vst [vmem:[%s892_s5 + $0x38] sm:$0xff] %v553_v37  ;;  %v560_v41 = vmul.f32 %v552_v36, %v530_v15  ;;  %v561_v42 = vmul.f32 %v551_v35, %v531_v16 }
 0x224   :  { %v556_v43 = vsub.f32 %v554_v38, %v555_v39  ;;  %v559_v44 = vsub.f32 %v557_v1, %v558_v40 }
 0x225   :  { %v562_v45 = vsub.f32 %v560_v41, %v561_v42 }
 0x226   :  { %565 = vst [vmem:[%s892_s5 + $0x10] sm:$0xff] %v556_v43  ;;  %568 = vst [vmem:[%s892_s5 + $0x28] sm:$0xff] %v559_v44 }
 0x227   :  { %571 = vst [vmem:[%s892_s5 + $0x40] sm:$0xff] %v562_v45 }
 0x228   :  { %581 = vsyncpa [#allocation3], 1 }
 0x229   :  { %582 = vsyncpa [#allocation5], 1 }

</bundles_post_ra>
